<compile_context>
chip_gen: v5e
topology: v5e:2x2
jax: 0.10.0
libtpu: 0.0.40
codegen_flags: <defaults>
</compile_context>

<pallas_src>
import math

import jax
import jax.numpy as jnp
from jax.experimental import pallas as pl
from jax.experimental.pallas import tpu as pltpu

_LANES = 128   # TPU lane width
_H1 = 128      # fused hidden-1 width (64 actor + 64 critic)
_H2 = 64       # fused hidden-2 width (32 actor + 32 critic)


def _round_up(x, m):
    return ((x + m - 1) // m) * m


def _choose_tile(B, tile_b):
    """Lane-axis (batch) tile size.

    The batch lives on the lane axis, so any tile smaller than the full batch
    must be a multiple of 128.  If the whole batch fits in one tile but is
    large, split it in two so the "parallel" grid axis shards across the two
    TensorCores on v7x (one extra ~0.35us grid step; harmless on v5e/v6e).
    """
    tile_b = max(_LANES, (tile_b // _LANES) * _LANES)
    if B > tile_b:
        return tile_b
    if B >= 4 * _LANES:
        return _round_up(-(-B // 2), _LANES)
    return B    # single full-extent block (any lane size is legal then)


def init_params(key, state_dim, action_dim, action_std):
    """PyTorch-Linear-style init (uniform +/- 1/sqrt(fan_in)).
    Weights stored as (in_features, out_features)."""
    half = action_dim // 2

    def linear(k, fan_in, fan_out):
        kw, kb = jax.random.split(k)
        bound = 1.0 / math.sqrt(fan_in)
        w = jax.random.uniform(kw, (fan_in, fan_out), jnp.float32, -bound, bound)
        b = jax.random.uniform(kb, (1, fan_out), jnp.float32, -bound, bound)
        return w, b

    keys = jax.random.split(key, 7)
    p = {}
    p["w1"], p["b1"] = linear(keys[0], state_dim, 64)
    p["w2"], p["b2"] = linear(keys[1], 64, 32)
    p["wa"], p["ba"] = linear(keys[2], 32, half)
    p["wb"], p["bb"] = linear(keys[3], 32, half)
    p["cw1"], p["cb1"] = linear(keys[4], state_dim, 64)
    p["cw2"], p["cb2"] = linear(keys[5], 64, 32)
    p["cw3"], p["cb3"] = linear(keys[6], 32, 1)
    action_var = jnp.full((1, action_dim), action_std * action_std, jnp.float32)
    p["var_a"] = action_var[:, :half]
    p["var_b"] = action_var[:, half:]
    return p


def _pack_params(params, action_dim, compute_dtype):
    """Fuse actor+critic layers into transposed (out, in) block-diagonal
    weights (cast to compute_dtype for the MXU) and pack all small f32
    constants (biases, inv-var, log-prob constant) into one (R, 1) slab."""
    half = action_dim // 2
    A = action_dim
    hw = A + 1

    # Fused weights, transposed to (out_features, in_features) for
    # batch-in-lanes matmuls  h = W^T @ x.
    w1t = jnp.concatenate([params["w1"], params["cw1"]], axis=1).T       # (128, S)
    w2f = jnp.zeros((_H1, _H2), jnp.float32)
    w2f = w2f.at[:64, :32].set(params["w2"]).at[64:, 32:].set(params["cw2"])
    w2t = w2f.T                                                          # (64, 128)
    w3f = jnp.zeros((_H2, hw), jnp.float32)
    w3f = w3f.at[:32, :half].set(params["wa"])
    w3f = w3f.at[:32, half:A].set(params["wb"])
    w3f = w3f.at[32:, A:].set(params["cw3"])
    w3t = w3f.T                                                          # (hw, 64)

    w1t = w1t.astype(compute_dtype)
    w2t = w2t.astype(compute_dtype)
    w3t = w3t.astype(compute_dtype)

    b1t = jnp.concatenate([params["b1"], params["cb1"]], axis=1).T       # (128, 1)
    b2t = jnp.concatenate([params["b2"], params["cb2"]], axis=1).T       # (64, 1)
    b3t = jnp.concatenate([params["ba"], params["bb"], params["cb3"]], axis=1).T

    var = jnp.concatenate([params["var_a"], params["var_b"]], axis=1)    # (1, A)
    ivar = (1.0 / var).T                                                 # (A, 1)
    logdet = jnp.sum(jnp.log(var))
    logp_const = jnp.reshape(
        -0.5 * (logdet + A * math.log(2.0 * math.pi)), (1, 1)).astype(jnp.float32)
    entropy = (0.5 * A * (1.0 + math.log(2.0 * math.pi))
               + 0.5 * logdet).astype(jnp.float32)

    # Consolidated constant slab (one input / one resident VMEM buffer).
    # Segments start on 8-sublane boundaries so the in-kernel slices are cheap.
    off_b1 = 0
    off_b2 = _H1                                  # 128
    off_b3 = _H1 + _H2                            # 192
    off_iv = off_b3 + _round_up(hw, 8)            # 200
    off_c = off_iv + _round_up(A, 8)              # 208
    rows = off_c + 8                              # 216
    consts = jnp.zeros((rows, 1), jnp.float32)
    consts = consts.at[off_b1:off_b1 + _H1].set(b1t)
    consts = consts.at[off_b2:off_b2 + _H2].set(b2t)
    consts = consts.at[off_b3:off_b3 + hw].set(b3t)
    consts = consts.at[off_iv:off_iv + A].set(ivar)
    consts = consts.at[off_c:off_c + 1].set(logp_const)

    offsets = dict(b1=off_b1, b2=off_b2, b3=off_b3, ivar=off_iv, const=off_c)
    return dict(w1t=w1t, w2t=w2t, w3t=w3t, consts=consts,
                offsets=offsets, entropy=entropy)


def _make_kernel(action_dim, offsets, compute_dtype):
    A = action_dim
    hw = A + 1
    o_b1, o_b2, o_b3 = offsets["b1"], offsets["b2"], offsets["b3"]
    o_iv, o_c = offsets["ivar"], offsets["const"]

    def kernel(state_ref, act_ref, w1_ref, w2_ref, w3_ref, c_ref, out_ref):
        # Static slices of the packed constant slab (all f32, broadcast over lanes).
        b1 = c_ref[o_b1:o_b1 + _H1, :]            # (128, 1)
        b2 = c_ref[o_b2:o_b2 + _H2, :]            # (64, 1)
        b3 = c_ref[o_b3:o_b3 + hw, :]             # (hw, 1)
        ivar = c_ref[o_iv:o_iv + A, :]            # (A, 1)  (zero-free, actions only)
        logp_c = c_ref[o_c:o_c + 1, :]            # (1, 1)

        # L1: fused actor+critic hidden-1 (batch on lanes, f32 accumulate).
        h1 = jnp.tanh(jnp.dot(w1_ref[...], state_ref[...],
                              preferred_element_type=jnp.float32) + b1)
        # L2: block-diagonal actor/critic hidden-2.
        h2 = jnp.tanh(jnp.dot(w2_ref[...], h1.astype(compute_dtype),
                              preferred_element_type=jnp.float32) + b2)
        # L3: fused heads -> [alpha | beta | value], kept in f32.
        m = jnp.dot(w3_ref[...], h2.astype(compute_dtype),
                    preferred_element_type=jnp.float32) + b3       # (hw, tb)

        diff = act_ref[...] - m[:A, :]                             # (A, tb)
        maha = jnp.sum(diff * diff * ivar, axis=0, keepdims=True)  # (1, tb)
        logp = logp_c - 0.5 * maha                                 # (1, tb)
        value = m[A:, :]                                           # (1, tb)

        # Lane-dense output: [logp ; value] as (2, tb) -> single unmasked-lane store.
        out_ref[...] = jnp.concatenate([logp, value], axis=0)

    return kernel


def actor_critic_evaluate(state, action, params, action_dim, *,
                          tile_b=4096, compute_dtype=jnp.bfloat16,
                          transposed_inputs=False):
    """Fused ActorCritic.evaluate.

    Returns (action_logprobs (B,), state_value (B,), dist_entropy (B,)).
    By default takes (B, S)/(B, A) row-major inputs and transposes them once in
    the wrapper (fused with the bf16 cast for state).  Callers that already
    hold feature-major (S, B)/(A, B) arrays can pass transposed_inputs=True to
    skip that pass entirely.
    """
    packed = _pack_params(params, action_dim, compute_dtype)
    A = action_dim

    if transposed_inputs:
        S, B = state.shape
        state_t = state.astype(compute_dtype)          # (S, B)
        act_t = action.astype(jnp.float32)             # (A, B)
    else:
        B, S = state.shape
        state_t = state.T.astype(compute_dtype)        # (S, B), cast fuses w/ transpose
        act_t = action.T.astype(jnp.float32)           # (A, B), VPU math stays f32

    tb = _choose_tile(B, tile_b)
    grid = (pl.cdiv(B, tb),)     # ragged last tile handled by masked edge blocks

    in_specs = [
        pl.BlockSpec((S, tb), lambda i: (0, i)),                  # state tile
        pl.BlockSpec((A, tb), lambda i: (0, i)),                  # action tile
        pl.BlockSpec(packed["w1t"].shape, lambda i: (0, 0)),      # resident fused W1
        pl.BlockSpec(packed["w2t"].shape, lambda i: (0, 0)),      # resident block-diag W2
        pl.BlockSpec(packed["w3t"].shape, lambda i: (0, 0)),      # resident fused heads
        pl.BlockSpec(packed["consts"].shape, lambda i: (0, 0)),   # biases/ivar/const slab
    ]
    out_spec = pl.BlockSpec((2, tb), lambda i: (0, i))            # lane-dense [logp; value]

    out = pl.pallas_call(
        _make_kernel(action_dim, packed["offsets"], compute_dtype),
        out_shape=jax.ShapeDtypeStruct((2, B), jnp.float32),
        grid=grid,
        in_specs=in_specs,
        out_specs=out_spec,
        compiler_params=pltpu.CompilerParams(
            dimension_semantics=("parallel",)),
    )(state_t, act_t, packed["w1t"], packed["w2t"], packed["w3t"],
      packed["consts"])

    logp = out[0]
    value = out[1]
    entropy = jnp.full((B,), packed["entropy"], jnp.float32)  # batch-independent const
    return logp, value, entropy


def _reference_evaluate(state, action, params, action_dim,
                        compute_dtype=jnp.float32):
    """Pure-JAX reference of ActorCritic.evaluate.  When compute_dtype is
    bfloat16 it mirrors the kernel's rounding points (state/weights/hidden
    activations fed to the MXU) so the comparison isolates kernel bugs from
    the intentional reduced-precision inputs."""
    f32 = jnp.float32

    def cd(x):
        return x.astype(compute_dtype).astype(f32)

    s = cd(state)
    x = jnp.tanh(s @ cd(params["w1"]) + params["b1"])
    x = jnp.tanh(cd(x) @ cd(params["w2"]) + params["b2"])
    xc = cd(x)
    alpha = xc @ cd(params["wa"]) + params["ba"]
    beta = xc @ cd(params["wb"]) + params["bb"]
    mean = jnp.concatenate([alpha, beta], axis=1)
    var = jnp.concatenate([params["var_a"], params["var_b"]], axis=1)
    diff = action - mean
    maha = jnp.sum(diff * diff / var, axis=-1)
    logdet = jnp.sum(jnp.log(var))
    logp = -0.5 * (maha + logdet + action_dim * math.log(2 * math.pi))
    ent = 0.5 * action_dim * (1 + math.log(2 * math.pi)) + 0.5 * logdet
    v = jnp.tanh(s @ cd(params["cw1"]) + params["cb1"])
    v = jnp.tanh(cd(v) @ cd(params["cw2"]) + params["cb2"])
    val = (cd(v) @ cd(params["cw3"]) + params["cb3"])[:, 0]
    return logp, val, jnp.full_like(logp, ent)


if __name__ == "__main__":
    state_dim, action_dim, action_std = 16, 4, 0.5

    key = jax.random.PRNGKey(0)
    kp, k1, k2, k3 = jax.random.split(key, 4)
    params = init_params(kp, state_dim, action_dim, action_std)

    def check(B, tile_b, compute_dtype, tol, seed_key):
        ks, ka = jax.random.split(seed_key)
        state = jax.random.normal(ks, (B, state_dim), jnp.float32)
        action = jax.random.normal(ka, (B, action_dim), jnp.float32)
        logp, val, ent = actor_critic_evaluate(
            state, action, params, action_dim,
            tile_b=tile_b, compute_dtype=compute_dtype)
        jax.block_until_ready((logp, val, ent))
        r_logp, r_val, r_ent = _reference_evaluate(
            state, action, params, action_dim, compute_dtype=compute_dtype)
        assert jnp.allclose(logp, r_logp, atol=tol, rtol=tol), (B, "logp")
        assert jnp.allclose(val, r_val, atol=tol, rtol=tol), (B, "value")
        assert jnp.allclose(ent, r_ent, atol=tol, rtol=tol), (B, "entropy")

    # 1) Small single-tile batch on the default bf16 MXU path.
    check(8, 4096, jnp.bfloat16, 1e-3, k1)
    # 2) Multi-tile grid with a ragged (masked) last tile, bf16 path.
    check(300, 128, jnp.bfloat16, 1e-3, k2)
    # 3) Exact f32 path; batch large enough to exercise the 2-tile megacore split.
    check(1024, 4096, jnp.float32, 2e-4, k3)

    print("KERNEL_OK")
</pallas_src>

<mosaic_0001>
module attributes {stable_mosaic.version = 11 : i64} {
  func.func @kernel(%arg0: i32, %arg1: memref<16x8xbf16, #tpu.memory_space<vmem>>, %arg2: memref<4x8xf32, #tpu.memory_space<vmem>>, %arg3: memref<128x16xbf16, #tpu.memory_space<vmem>>, %arg4: memref<64x128xbf16, #tpu.memory_space<vmem>>, %arg5: memref<5x64xbf16, #tpu.memory_space<vmem>>, %arg6: memref<216x1xf32, #tpu.memory_space<vmem>>, %arg7: memref<2x8xf32, #tpu.memory_space<vmem>>) attributes {dimension_semantics = [#tpu.dimension_semantics<parallel>], iteration_bounds = array<i64: 1>, scalar_prefetch = 0 : i64, scratch_operands = 0 : i64, tpu.core_type = #tpu.core_type<tc>, window_params = [{transform_indices = @transform_0, window_bounds = array<i64: 16, 8>}, {transform_indices = @transform_1, window_bounds = array<i64: 4, 8>}, {pipeline_mode = #tpu.pipeline_mode<synchronous>, transform_indices = @transform_2, window_bounds = array<i64: 128, 16>}, {pipeline_mode = #tpu.pipeline_mode<synchronous>, transform_indices = @transform_3, window_bounds = array<i64: 64, 128>}, {pipeline_mode = #tpu.pipeline_mode<synchronous>, transform_indices = @transform_4, window_bounds = array<i64: 5, 64>}, {pipeline_mode = #tpu.pipeline_mode<synchronous>, transform_indices = @transform_5, window_bounds = array<i64: 216, 1>}, {transform_indices = @transform_6, window_bounds = array<i64: 2, 8>}]} {
    %c0 = arith.constant 0 : index
    %c0_0 = arith.constant 0 : index
    %0 = vector.load %arg6[%c0, %c0_0] : memref<216x1xf32, #tpu.memory_space<vmem>>, vector<128x1xf32>
    %c128 = arith.constant 128 : index
    %c0_1 = arith.constant 0 : index
    %1 = vector.load %arg6[%c128, %c0_1] : memref<216x1xf32, #tpu.memory_space<vmem>>, vector<64x1xf32>
    %c192 = arith.constant 192 : index
    %c0_2 = arith.constant 0 : index
    %2 = vector.load %arg6[%c192, %c0_2] : memref<216x1xf32, #tpu.memory_space<vmem>>, vector<5x1xf32>
    %c200 = arith.constant 200 : index
    %c0_3 = arith.constant 0 : index
    %3 = vector.load %arg6[%c200, %c0_3] : memref<216x1xf32, #tpu.memory_space<vmem>>, vector<4x1xf32>
    %c208 = arith.constant 208 : index
    %c0_4 = arith.constant 0 : index
    %4 = vector.load %arg6[%c208, %c0_4] : memref<216x1xf32, #tpu.memory_space<vmem>>, vector<1x1xf32>
    %c0_5 = arith.constant 0 : index
    %c0_6 = arith.constant 0 : index
    %5 = vector.load %arg3[%c0_5, %c0_6] : memref<128x16xbf16, #tpu.memory_space<vmem>>, vector<128x16xbf16>
    %c0_7 = arith.constant 0 : index
    %c0_8 = arith.constant 0 : index
    %6 = vector.load %arg1[%c0_7, %c0_8] : memref<16x8xbf16, #tpu.memory_space<vmem>>, vector<16x8xbf16>
    %cst = arith.constant dense<0.000000e+00> : vector<128x8xf32>
    %7 = tpu.matmul %5, %6, %cst {dimension_numbers = #tpu.dot_dimension_numbers<[1], [0], [0], [1], [0, 0, 1, 1], [], []>} : vector<128x16xbf16>, vector<16x8xbf16>, vector<128x8xf32> -> vector<128x8xf32>
    %8 = vector.broadcast %0 : vector<128x1xf32> to vector<128x8xf32>
    %9 = arith.addf %7, %8 : vector<128x8xf32>
    %10 = math.tanh %9 : vector<128x8xf32>
    %c0_9 = arith.constant 0 : index
    %c0_10 = arith.constant 0 : index
    %11 = vector.load %arg4[%c0_9, %c0_10] : memref<64x128xbf16, #tpu.memory_space<vmem>>, vector<64x128xbf16>
    %12 = arith.truncf %10 : vector<128x8xf32> to vector<128x8xbf16>
    %cst_11 = arith.constant dense<0.000000e+00> : vector<64x8xf32>
    %13 = tpu.matmul %11, %12, %cst_11 {dimension_numbers = #tpu.dot_dimension_numbers<[1], [0], [0], [1], [0, 0, 1, 1], [], []>} : vector<64x128xbf16>, vector<128x8xbf16>, vector<64x8xf32> -> vector<64x8xf32>
    %14 = vector.broadcast %1 : vector<64x1xf32> to vector<64x8xf32>
    %15 = arith.addf %13, %14 : vector<64x8xf32>
    %16 = math.tanh %15 : vector<64x8xf32>
    %c0_12 = arith.constant 0 : index
    %c0_13 = arith.constant 0 : index
    %17 = vector.load %arg5[%c0_12, %c0_13] : memref<5x64xbf16, #tpu.memory_space<vmem>>, vector<5x64xbf16>
    %18 = arith.truncf %16 : vector<64x8xf32> to vector<64x8xbf16>
    %cst_14 = arith.constant dense<0.000000e+00> : vector<5x8xf32>
    %19 = tpu.matmul %17, %18, %cst_14 {dimension_numbers = #tpu.dot_dimension_numbers<[1], [0], [0], [1], [0, 0, 1, 1], [], []>} : vector<5x64xbf16>, vector<64x8xbf16>, vector<5x8xf32> -> vector<5x8xf32>
    %20 = vector.broadcast %2 : vector<5x1xf32> to vector<5x8xf32>
    %21 = arith.addf %19, %20 : vector<5x8xf32>
    %c0_15 = arith.constant 0 : index
    %c0_16 = arith.constant 0 : index
    %22 = vector.load %arg2[%c0_15, %c0_16] : memref<4x8xf32, #tpu.memory_space<vmem>>, vector<4x8xf32>
    %23 = vector.extract_strided_slice %21 {offsets = [0, 0], sizes = [4, 8], strides = [1, 1]} : vector<5x8xf32> to vector<4x8xf32>
    %24 = arith.subf %22, %23 : vector<4x8xf32>
    %25 = arith.mulf %24, %24 : vector<4x8xf32>
    %26 = vector.broadcast %3 : vector<4x1xf32> to vector<4x8xf32>
    %27 = arith.mulf %25, %26 : vector<4x8xf32>
    %cst_17 = arith.constant dense<0.000000e+00> : vector<8xf32>
    %28 = vector.multi_reduction <add>, %27, %cst_17 [0] : vector<4x8xf32> to vector<8xf32>
    %29 = vector.shape_cast %28 : vector<8xf32> to vector<1x8xf32>
    %cst_18 = arith.constant 5.000000e-01 : f32
    %30 = vector.broadcast %cst_18 : f32 to vector<1x8xf32>
    %31 = arith.mulf %30, %29 : vector<1x8xf32>
    %32 = vector.broadcast %4 : vector<1x1xf32> to vector<1x8xf32>
    %33 = arith.subf %32, %31 : vector<1x8xf32>
    %34 = vector.extract_strided_slice %21 {offsets = [4, 0], sizes = [1, 8], strides = [1, 1]} : vector<5x8xf32> to vector<1x8xf32>
    %35 = tpu.concatenate %33, %34 in 0 : vector<1x8xf32>, vector<1x8xf32> -> vector<2x8xf32>
    %c0_19 = arith.constant 0 : index
    %c0_20 = arith.constant 0 : index
    %36 = vector.load %arg7[%c0_19, %c0_20] : memref<2x8xf32, #tpu.memory_space<vmem>>, vector<2x8xf32>
    tpu.vector_store %arg7[%c0_19, %c0_20], %35 {strides = array<i32>} : memref<2x8xf32, #tpu.memory_space<vmem>>, vector<2x8xf32>,
    return
  }
  func.func @transform_0(%arg0: i32) -> (i32, i32) {
    %c0_i32 = arith.constant 0 : i32
    %c0_i32_0 = arith.constant 0 : i32
    return %c0_i32, %arg0 : i32, i32
  }
  func.func @transform_1(%arg0: i32) -> (i32, i32) {
    %c0_i32 = arith.constant 0 : i32
    %c0_i32_0 = arith.constant 0 : i32
    return %c0_i32, %arg0 : i32, i32
  }
  func.func @transform_2(%arg0: i32) -> (i32, i32) {
    %c0_i32 = arith.constant 0 : i32
    %c0_i32_0 = arith.constant 0 : i32
    %c0_i32_1 = arith.constant 0 : i32
    return %c0_i32, %c0_i32_0 : i32, i32
  }
  func.func @transform_3(%arg0: i32) -> (i32, i32) {
    %c0_i32 = arith.constant 0 : i32
    %c0_i32_0 = arith.constant 0 : i32
    %c0_i32_1 = arith.constant 0 : i32
    return %c0_i32, %c0_i32_0 : i32, i32
  }
  func.func @transform_4(%arg0: i32) -> (i32, i32) {
    %c0_i32 = arith.constant 0 : i32
    %c0_i32_0 = arith.constant 0 : i32
    %c0_i32_1 = arith.constant 0 : i32
    return %c0_i32, %c0_i32_0 : i32, i32
  }
  func.func @transform_5(%arg0: i32) -> (i32, i32) {
    %c0_i32 = arith.constant 0 : i32
    %c0_i32_0 = arith.constant 0 : i32
    %c0_i32_1 = arith.constant 0 : i32
    return %c0_i32, %c0_i32_0 : i32, i32
  }
  func.func @transform_6(%arg0: i32) -> (i32, i32) {
    %c0_i32 = arith.constant 0 : i32
    %c0_i32_0 = arith.constant 0 : i32
    return %c0_i32, %arg0 : i32, i32
  }
}

</mosaic_0001>

<bundles_post_ra>
// kernel: tpu_custom_call.1
= control target key start
LH: loop header
LB: loop body
LE: loop exit
PB: predicated region body
PF: predicated region fallthrough
CT: control target
= control target key end

     0   :  { %v639_v2 = vmov 0   ;;  %vm196_vm0 = vcmask 130048   ;;  %s822_s0 = inlined_call_operand.vmem [shape: bf16[16,8], index: 0, kind: input, shape index: {}]   ;;  %s823_s1 = inlined_call_operand.vmem [shape: f32[4,8], index: 1, kind: input, shape index: {}]   ;;  %s824_s2 = inlined_call_operand.vmem [shape: bf16[128,16], index: 2, kind: input, shape index: {}]   ;;  %s825_s3 = inlined_call_operand.vmem [shape: bf16[64,128], index: 3, kind: input, shape index: {}]   ;;  %s826_s4 = inlined_call_operand.vmem [shape: bf16[5,64], index: 4, kind: input, shape index: {}]   ;;  %s827_s5 = inlined_call_operand.vmem [shape: f32[216,1], index: 5, kind: input, shape index: {}]   ;;  %s828_s6 = inlined_call_operand.hbm [shape: f32[2,8], index: 6, kind: output, shape index: {}]  }
   0x1   :  { %v39_v0 = vld [vmem:[%s827_s5 + $0x70] sm:$0xff]  ;;  %v546_v1 = vld [vmem:[%s822_s0] sm:$0xff]  ;;  %562 = vset.pattern.permute.xlu0 %v639_v2  ;;  %563 = vset.pattern.permute.xlu1 %v639_v2 }
   0x2   :  { %v538_v3 = vld [vmem:[%s824_s2] sm:$0xff]  ;;  %142 = vperm.xlu0 %562, %v39_v0   ;;  %228 = vmatpush.bf16.msra.mxu0 %v546_v1  ;;  %v35_v6 = vld [vmem:[%s827_s5 + $0x50] sm:$0xff] }
   0x3   :  { %v37_v4 = vld [vmem:[%s827_s5 + $0x60] sm:$0xff]  ;;  %551 = vmatpush.bf16.msra.mxu3 %v546_v1  ;;  %564 = vset.pattern.permute.xlu2 %v639_v2 }
   0x4   :  { %v542_v5 = vld [vmem:[%s824_s2 + $0x20] sm:$0xff]  ;;  %132 = vperm.xlu1 %563, %v37_v4   ;;  %122 = vperm.xlu2 %564, %v35_v6  }
   0x5   :  { %513 = vmatmul.msk.bf16.vlgmr.msra.gmra.mxu0 %vm196_vm0, %v538_v3 }
   0x6   :  { %11 = vsyncpa [#allocation3], 0  ;;  %517 = vmatmul.msk.bf16.vlgmr.msra.gmra.mxu3 %vm196_vm0, %v542_v5  ;;  %v40_v7 = vld [vmem:[%s827_s5 + $0x78] sm:$0xff]  ;;  %v38_v8 = vld [vmem:[%s827_s5 + $0x68] sm:$0xff]  ;;  %vm413_vm1 = vcmask 523264   ;;  %vm439_vm2 = vcmask 60416  }
   0x7   :  { %v36_v9 = vld [vmem:[%s827_s5 + $0x58] sm:$0xff]  ;;  %v33_v10 = vld [vmem:[%s827_s5 + $0x40] sm:$0xff]  ;;  %v34_v11 = vld [vmem:[%s827_s5 + $0x48] sm:$0xff]  ;;  %vm457_vm3 = vcmask 1040384   ;;  %vm459_vm4 = vcmask 58368  }
   0x8   :  { %v539_v12 = vld [vmem:[%s824_s2 + $0x8] sm:$0xff]  ;;  %v31_v14 = vld [vmem:[%s827_s5 + $0x30] sm:$0xff]  ;;  %v32_v15 = vld [vmem:[%s827_s5 + $0x38] sm:$0xff] }
   0x9   :  { %v543_v13 = vld [vmem:[%s824_s2 + $0x28] sm:$0xff]  ;;  %v29_v16 = vld [vmem:[%s827_s5 + $0x20] sm:$0xff]  ;;  %v27_v18 = vld [vmem:[%s827_s5 + $0x10] sm:$0xff] }
   0xa   :  { %147 = vperm.xlu0 %562, %v40_v7   ;;  %v30_v17 = vld [vmem:[%s827_s5 + $0x28] sm:$0xff]  ;;  %v28_v19 = vld [vmem:[%s827_s5 + $0x18] sm:$0xff]  ;;  %v540_v20 = vld [vmem:[%s824_s2 + $0x10] sm:$0xff] }
   0xb   :  { %v544_v21 = vld [vmem:[%s824_s2 + $0x30] sm:$0xff]  ;;  %v25_v22 = vld [vmem:[%s827_s5] sm:$0xff]  ;;  %v26_v23 = vld [vmem:[%s827_s5 + $0x8] sm:$0xff] }
   0xc   :  { %137 = vperm.xlu1 %563, %v38_v8   ;;  %127 = vperm.xlu2 %564, %v36_v9   ;;  %v47_v24 = vld [vmem:[%s827_s5 + $0xb0] sm:$0xff]  ;;  %v48_v25 = vld [vmem:[%s827_s5 + $0xb8] sm:$0xff]  ;;  %v45_v26 = vld [vmem:[%s827_s5 + $0xa0] sm:$0xff] }
   0xd   :  { %v46_v27 = vld [vmem:[%s827_s5 + $0xa8] sm:$0xff]  ;;  %v541_v28 = vld [vmem:[%s824_s2 + $0x18] sm:$0xff]  ;;  %v43_v30 = vld [vmem:[%s827_s5 + $0x90] sm:$0xff] }
   0xe   :  { %v545_v29 = vld [vmem:[%s824_s2 + $0x38] sm:$0xff]  ;;  %v41_v32 = vld [vmem:[%s827_s5 + $0x80] sm:$0xff]  ;;  %v42_v33 = vld [vmem:[%s827_s5 + $0x88] sm:$0xff] }
   0xf   :  { %v44_v31 = vld [vmem:[%s827_s5 + $0x98] sm:$0xff]  ;;  %v49_v34 = vld [vmem:[%s827_s5 + $0xc0] sm:$0x1f]  ;;  %v50_v35 = vld [vmem:[%s827_s5 + $0xc8] sm:$0xf] }
  0x10   :  { %v51_v36 = vld [vmem:[%s827_s5 + $0xd0] sm:$0x1] }
  0x12   :  { %112 = vperm.xlu0 %562, %v33_v10  }
  0x14   :  { %117 = vperm.xlu1 %563, %v34_v11   ;;  %102 = vperm.xlu2 %564, %v31_v14  }
  0x15   :  { %514 = vmatmul.msk.bf16.gmra.mxu0 %vm196_vm0, %v539_v12 }
  0x16   :  { %518 = vmatmul.msk.bf16.gmra.mxu3 %vm196_vm0, %v543_v13 }
  0x1a   :  { %107 = vperm.xlu0 %562, %v32_v15  }
  0x1c   :  { %92 = vperm.xlu1 %563, %v29_v16   ;;  %97 = vperm.xlu2 %564, %v30_v17  }
  0x22   :  { %82 = vperm.xlu0 %562, %v27_v18  }
  0x24   :  { %87 = vperm.xlu1 %563, %v28_v19   ;;  %72 = vperm.xlu2 %564, %v25_v22  }
  0x25   :  { %515 = vmatmul.msk.bf16.gmra.mxu0 %vm196_vm0, %v540_v20 }
  0x26   :  { %519 = vmatmul.msk.bf16.gmra.mxu3 %vm196_vm0, %v544_v21 }
  0x2a   :  { %77 = vperm.xlu0 %562, %v26_v23  }
  0x2c   :  { %334 = vperm.xlu1 %563, %v47_v24   ;;  %339 = vperm.xlu2 %564, %v48_v25  }
  0x32   :  { %324 = vperm.xlu0 %562, %v45_v26  }
  0x34   :  { %329 = vperm.xlu1 %563, %v46_v27   ;;  %314 = vperm.xlu2 %564, %v43_v30  }
  0x35   :  { %516 = vmatmul.msk.bf16.gmra.mxu0 %vm196_vm0, %v541_v28 }
  0x36   :  { %520 = vmatmul.msk.bf16.gmra.mxu3 %vm196_vm0, %v545_v29 }
  0x3a   :  { %319 = vperm.xlu0 %562, %v44_v31  }
  0x3c   :  { %304 = vperm.xlu1 %563, %v41_v32   ;;  %309 = vperm.xlu2 %564, %v42_v33  }
  0x42   :  { %410 = vperm.xlu0 %562, %v49_v34  }
  0x44   :  { %435 = vperm.xlu1 %563, %v50_v35   ;;  %450 = vperm.xlu2 %564, %v51_v36  }
  0x5e   :  { %v123_v50 = vpop.permute.xlu2 %122 }
  0x66   :  { %v128_v56 = vpop.permute.xlu2 %127 }
  0x6e   :  { %v103_v1 = vpop.permute.xlu2 %102 }
  0x74   :  { %v143_v45 = vpop.permute.xlu0 %142 }
  0x76   :  { %v133_v47 = vpop.permute.xlu1 %132  ;;  %v98_v16 = vpop.permute.xlu2 %97 }
  0x7c   :  { %v148_v49 = vpop.permute.xlu0 %147 }
  0x7e   :  { %v138_v52 = vpop.permute.xlu1 %137  ;;  %v73_v32 = vpop.permute.xlu2 %72 }
  0x82   :  { %v792_v37 = vpop.f32.mrf.mxu0 }
  0x84   :  { %v113_v54 = vpop.permute.xlu0 %112 }
  0x86   :  { %v118_v58 = vpop.permute.xlu1 %117 }
  0x89   :  { %v250_v38 = vpop.f32.mrf.mxu3 }
  0x8a   :  { %v794_v39 = vpop.f32.mrf.mxu0  ;;  %v251_v11 = vadd.f32 %v250_v38, %v113_v54  ;;  %v231_v38 = vadd.f32 %v792_v37, %v73_v32  ;;  %v550_v37 = vld [vmem:[%s825_s3 + $0x18] sm:$0xff]  ;;  %v340_v54 = vpop.permute.xlu2 %339 }
  0x8c   :  { %v108_v63 = vpop.permute.xlu0 %107 }
  0x8e   :  { %v93_v7 = vpop.permute.xlu1 %92 }
  0x91   :  { %v252_v40 = vpop.f32.mrf.mxu3 }
  0x92   :  { %v235_v41 = vpop.f32.mrf.mxu0  ;;  %v253_v6 = vadd.f32 %v252_v40, %v118_v58 }
  0x94   :  { %v83_v12 = vpop.permute.xlu0 %82 }
  0x95   :  { %v236_v24 = vadd.f32 %v235_v41, %v83_v12 }
  0x96   :  { %v88_v25 = vpop.permute.xlu1 %87 }
  0x99   :  { %v255_v42 = vpop.f32.mrf.mxu3 }
  0x9a   :  { %v796_v44 = vpop.f32.mrf.mxu0  ;;  %v256_v3 = vadd.f32 %v255_v42, %v123_v50 }
  0x9b   :  { %v238_v27 = vadd.f32 %v796_v44, %v88_v25 }
  0x9c   :  { %v78_v29 = vpop.permute.xlu0 %77 }
  0x9d   :  { %v233_v33 = vadd.f32 %v794_v39, %v78_v29 }
  0xa1   :  { %v257_v43 = vpop.f32.mrf.mxu3 }
  0xa2   :  { %v240_v48 = vpop.f32.mrf.mxu0  ;;  %v258_v2 = vadd.f32 %v257_v43, %v128_v56 }
  0xa3   :  { %v241_v19 = vadd.f32 %v240_v48, %v93_v7  ;;  %v549_v48 = vld [vmem:[%s825_s3 + $0x10] sm:$0xff] }
  0xa9   :  { %v260_v46 = vpop.f32.mrf.mxu3 }
  0xaa   :  { %v242_v53 = vpop.f32.mrf.mxu0  ;;  %v261_v0 = vadd.f32 %v260_v46, %v133_v47  ;;  %v547_v46 = vld [vmem:[%s825_s3] sm:$0xff]  ;;  %v548_v47 = vld [vmem:[%s825_s3 + $0x8] sm:$0xff] }
  0xab   :  { %v243_v21 = vadd.f32 %v242_v53, %v98_v16 }
  0xb1   :  { %v262_v51 = vpop.f32.mrf.mxu3 }
  0xb2   :  { %v245_v59 = vpop.f32.mrf.mxu0  ;;  %v263_v61 = vadd.f32 %v262_v51, %v138_v52  ;;  %v335_v52 = vpop.permute.xlu1 %334 }
  0xb3   :  { %v246_v13 = vadd.f32 %v245_v59, %v103_v1 }
  0xb9   :  { %v265_v55 = vpop.f32.mrf.mxu3 }
  0xba   :  { %v266_v57 = vadd.f32 %v265_v55, %v143_v45  ;;  %v247_v8 = vpop.f32.mrf.mxu0  ;;  %v330_v1 = vpop.permute.xlu1 %329 }
  0xbb   :  { %v248_v15 = vadd.f32 %v247_v8, %v108_v63 }
  0xbc   :  { %565 = vtanh.f32 %v266_v57 }
  0xc1   :  { %v267_v60 = vpop.f32.mrf.mxu3 }
  0xc2   :  { %v268_v62 = vadd.f32 %v267_v60, %v148_v49  ;;  %v566_v4 = vpop.eup %565 }
  0xc4   :  { %567 = vtanh.f32 %v268_v62  ;;  %v325_v62 = vpop.permute.xlu0 %324 }
  0xc5   :  { %569 = vtanh.f32 %v263_v61 }
  0xc6   :  { %571 = vtanh.f32 %v261_v0  ;;  %v315_v0 = vpop.permute.xlu2 %314 }
  0xc7   :  { %573 = vtanh.f32 %v258_v2 }
  0xc8   :  { %575 = vtanh.f32 %v256_v3 }
  0xc9   :  { %577 = vtanh.f32 %v253_v6 }
  0xca   :  { %v568_v5 = vpop.eup %567  ;;  %579 = vtanh.f32 %v251_v11 }
  0xcb   :  { %v301_v9 = vpack.c.bf16 %v568_v5, %v566_v4  ;;  %v570_v10 = vpop.eup %569  ;;  %581 = vtanh.f32 %v246_v13 }
  0xcc   :  { %v572_v14 = vpop.eup %571  ;;  %583 = vtanh.f32 %v248_v15  ;;  %v320_v3 = vpop.permute.xlu0 %319 }
  0xcd   :  { %366 = vmatpush.bf16.msra.mxu1 %v301_v9  ;;  %552 = vmatpush.bf16.msra.mxu2 %v301_v9  ;;  %v300_v17 = vpack.c.bf16 %v570_v10, %v572_v14  ;;  %v574_v18 = vpop.eup %573  ;;  %585 = vtanh.f32 %v241_v19  ;;  %v305_v10 = vpop.permute.xlu1 %304 }
  0xce   :  { %v576_v20 = vpop.eup %575  ;;  %587 = vtanh.f32 %v243_v21  ;;  %v310_v8 = vpop.permute.xlu2 %309  ;;  %v403_v21 = vld [vmem:[%s826_s4] sm:$0x7]  ;;  %s640_s4 = smov [#allocation2]  }
  0xcf   :  { %v299_v22 = vpack.c.bf16 %v574_v18, %v576_v20  ;;  %v578_v23 = vpop.eup %577  ;;  %589 = vtanh.f32 %v236_v24  ;;  %v430_v24 = vld [vmem:[%s823_s1] sm:$0xf]  ;;  %s466_s27 = sshll.u32 %s640_s4, 4  ;;  %s468_s1 = sshll.u32 %s828_s6, 4  ;;  %s467_s27 = int_to_ptr.vmem [resolvable:$true] %s466_s27  ;;  %s469_s1 = int_to_ptr.hbm [resolvable:$true] %s468_s1 }
  0xd0   :  { %v580_v26 = vpop.eup %579  ;;  %591 = vtanh.f32 %v238_v27 }
  0xd1   :  { %367 = vmatpush.bf16.msra.mxu1 %v300_v17  ;;  %553 = vmatpush.bf16.msra.mxu2 %v300_v17  ;;  %v582_v28 = vpop.eup %581  ;;  %v298_v30 = vpack.c.bf16 %v578_v23, %v580_v26  ;;  %593 = vtanh.f32 %v233_v33 }
  0xd2   :  { %v584_v31 = vpop.eup %583  ;;  %595 = vtanh.f32 %v231_v38 }
  0xd3   :  { %v586_v34 = vpop.eup %585  ;;  %v297_v35 = vpack.c.bf16 %v584_v31, %v582_v28 }
  0xd4   :  { %v588_v36 = vpop.eup %587 }
  0xd5   :  { %368 = vmatpush.bf16.msra.mxu1 %v299_v22  ;;  %554 = vmatpush.bf16.msra.mxu2 %v299_v22  ;;  %v590_v40 = vpop.eup %589  ;;  %v296_v41 = vpack.c.bf16 %v588_v36, %v586_v34  ;;  %v411_v22 = vpop.permute.xlu0 %410 }
  0xd6   :  { %v592_v42 = vpop.eup %591  ;;  %v436_v28 = vpop.permute.xlu1 %435 }
  0xd7   :  { %v295_v43 = vpack.c.bf16 %v592_v42, %v590_v40  ;;  %v594_v44 = vpop.eup %593 }
  0xd8   :  { %v596_v45 = vpop.eup %595 }
  0xd9   :  { %369 = vmatpush.bf16.msra.mxu1 %v298_v30  ;;  %555 = vmatpush.bf16.msra.mxu2 %v298_v30  ;;  %v294_v39 = vpack.c.bf16 %v594_v44, %v596_v45 }
  0xdd   :  { %370 = vmatpush.bf16.msra.mxu1 %v297_v35  ;;  %556 = vmatpush.bf16.msra.mxu2 %v297_v35 }
  0xe1   :  { %371 = vmatpush.bf16.msra.mxu1 %v296_v41  ;;  %557 = vmatpush.bf16.msra.mxu2 %v296_v41  ;;  %v451_v41 = vpop.permute.xlu2 %450 }
  0xe5   :  { %372 = vmatpush.bf16.msra.mxu1 %v295_v43  ;;  %558 = vmatpush.bf16.msra.mxu2 %v295_v43 }
  0xe9   :  { %373 = vmatpush.bf16.msra.mxu1 %v294_v39  ;;  %559 = vmatpush.bf16.msra.mxu2 %v294_v39 }
  0xec   :  { %374 = vmatmul.bf16.vlgmr.msra.gmra.mxu1 %v547_v46  ;;  %389 = vmatmul.bf16.vlgmr.msra.gmra.mxu2 %v550_v37 }
  0xfc   :  { %379 = vmatmul.bf16.gmra.mxu1 %v548_v47 }
 0x10c   :  { %384 = vmatmul.bf16.gmra.mxu1 %v549_v48 }
 0x169   :  { %v375_v49 = vpop.f32.mrf.mxu1 }
 0x16a   :  { %v376_v11 = vadd.f32 %v375_v49, %v305_v10 }
 0x16f   :  { %v390_v50 = vpop.f32.mrf.mxu2 }
 0x170   :  { %v391_v53 = vadd.f32 %v390_v50, %v335_v52 }
 0x171   :  { %v377_v51 = vpop.f32.mrf.mxu1 }
 0x172   :  { %597 = vtanh.f32 %v391_v53  ;;  %v378_v9 = vadd.f32 %v377_v51, %v310_v8 }
 0x177   :  { %v392_v55 = vpop.f32.mrf.mxu2 }
 0x178   :  { %v393_v56 = vadd.f32 %v392_v55, %v340_v54  ;;  %v598_v58 = vpop.eup %597 }
 0x179   :  { %v380_v57 = vpop.f32.mrf.mxu1 }
 0x17a   :  { %599 = vtanh.f32 %v393_v56  ;;  %v381_v7 = vadd.f32 %v380_v57, %v315_v0 }
 0x180   :  { %v600_v59 = vpop.eup %599 }
 0x181   :  { %v382_v60 = vpop.f32.mrf.mxu1  ;;  %v407_v61 = vpack.c.bf16 %v600_v59, %v598_v58 }
 0x182   :  { %v383_v5 = vadd.f32 %v382_v60, %v320_v3 }
 0x183   :  { %421 = vmatpush.bf16.msrb.mxu2 %v407_v61 }
 0x189   :  { %v385_v63 = vpop.f32.mrf.mxu1 }
 0x18a   :  { %v386_v2 = vadd.f32 %v385_v63, %v325_v62 }
 0x18c   :  { %601 = vtanh.f32 %v386_v2 }
 0x191   :  { %v387_v4 = vpop.f32.mrf.mxu1 }
 0x192   :  { %v388_v6 = vadd.f32 %v387_v4, %v330_v1  ;;  %v602_v12 = vpop.eup %601 }
 0x194   :  { %603 = vtanh.f32 %v388_v6 }
 0x195   :  { %605 = vtanh.f32 %v383_v5 }
 0x196   :  { %607 = vtanh.f32 %v381_v7 }
 0x197   :  { %609 = vtanh.f32 %v378_v9 }
 0x198   :  { %611 = vtanh.f32 %v376_v11 }
 0x19a   :  { %v604_v13 = vpop.eup %603 }
 0x19b   :  { %v406_v14 = vpack.c.bf16 %v604_v13, %v602_v12  ;;  %v606_v15 = vpop.eup %605 }
 0x19c   :  { %v608_v16 = vpop.eup %607 }
 0x19d   :  { %422 = vmatpush.bf16.msrb.mxu2 %v406_v14  ;;  %v405_v17 = vpack.c.bf16 %v606_v15, %v608_v16  ;;  %v610_v18 = vpop.eup %609 }
 0x19e   :  { %v612_v19 = vpop.eup %611 }
 0x19f   :  { %v404_v20 = vpack.c.bf16 %v610_v18, %v612_v19 }
 0x1a1   :  { %423 = vmatpush.bf16.msrb.mxu2 %v405_v17 }
 0x1a5   :  { %424 = vmatpush.bf16.msrb.mxu2 %v404_v20 }
 0x1a8   :  { %537 = vmatmul.msk.bf16.vlgmr.msrb.gmra.mxu2 %vm413_vm1, %v403_v21 }
 0x22b   :  { %v426_v23 = vpop.f32.mrf.mxu2 }
 0x22c   :  { %v427_v25 = vadd.f32 %v426_v23, %v411_v22 }
 0x22e   :  { %v431_v26 = vsub.f32 %v430_v24, %v427_v25  ;;  %v455_v42 = vrot.slane %v427_v25, 3 }
 0x230   :  { %v432_v27 = vmul.f32 %v431_v26, %v431_v26 }
 0x232   :  { %v438_v29 = vmul.f32 %v436_v28, %v432_v27 }
 0x233   :  { %v428_v30 = vpop.f32.mrf.mxu2 }
 0x234   :  { %v440_v31 = vsel %vm439_vm2, %v438_v29, 0.0 }
 0x235   :  { %v441_v32 = vrot.slane %v440_v31, 4 }
 0x237   :  { %v442_v33 = vadd.f32 %v441_v32, %v440_v31 }
 0x239   :  { %v443_v34 = vrot.slane %v442_v33, 2 }
 0x23b   :  { %v444_v35 = vadd.f32 %v443_v34, %v442_v33 }
 0x23d   :  { %v445_v36 = vrot.slane %v444_v35, 1 }
 0x23f   :  { %v446_v38 = vadd.f32 %v445_v36, %v444_v35 }
 0x241   :  { %v447_v40 = vmul.f32 0.5, %v446_v38 }
 0x243   :  { %v453_v43 = vsub.f32 %v451_v41, %v447_v40 }
 0x245   :  { %v458_v44 = vsel %vm457_vm3, %v453_v43, %v455_v42 }
 0x246   :  { %460 = vst.msk [vmem:[#allocation2] sm:$0x3] %vm459_vm4, %v458_v44 }
 0x247   :  { %471 = dma.vmem_to_hbm [thread:$0]  %s467_s27, 32, %s469_s1, [#allocation3]  }
 0x248   :  { %637 = dma.done.wait [#allocation3], 32  }
 0x249   :  { %638 = vsyncadd [#allocation3], 4294967264 }
 0x24a   :  { %476 = vsyncpa [#allocation3], 1 }

</bundles_post_ra>
